<compile_context>
chip_gen: v7x
topology: tpu7x:2x2x1
jax: 0.10.0
libtpu: 0.0.40
codegen_flags: <defaults>
</compile_context>

<pallas_src>
import math

import jax
import jax.numpy as jnp
from jax.experimental import pallas as pl
from jax.experimental.pallas import tpu as pltpu


def _add_kernel(x_ref, y_ref, o_ref):
    # z = cat([x]) == x (identity), then out = y + z.
    o_ref[...] = y_ref[...] + x_ref[...]


_MIN_KERNEL_ELEMS = 64 * 1024   # below this, the fused XLA add is strictly faster
_MAX_LANE_WIDTH = 8192          # cap on the lane-dense width C


def _cdiv(a, b):
    return -(-a // b)


def _round_up(a, b):
    return _cdiv(a, b) * b


def _target_block_bytes():
    # ~VMEM/16 per block: 4 MiB on v7x (64 MiB VMEM), 8 MiB on v5e/v6e (128 MiB).
    try:
        vmem = pltpu.get_tpu_info().vmem_capacity_bytes
    except Exception:
        vmem = 64 * 1024 * 1024
    return max(1 << 20, min(8 << 20, vmem // 16))


def cat_then_add(x: jax.Array, y: jax.Array, *, in_place: bool = False):
    """Computes y + cat([x]) == y + x with a lane-dense, row-tiled Pallas kernel."""
    assert x.shape == y.shape, "broadcasting not needed for this module's inputs"
    assert x.dtype == y.dtype

    orig_shape = x.shape
    n = math.prod(orig_shape) if orig_shape else 1
    itemsize = x.dtype.itemsize

    # Tiny or lane-awkward inputs (incl. the module's (1,) case): skip the kernel.
    if n < _MIN_KERNEL_ELEMS or n % 128 != 0:
        return y + x

    # Elementwise on contiguous data -> layout is free: flatten and re-factor into
    # (R, C) with C the largest multiple of 128 (<= 8192) that divides n.
    C = 128
    for k in range(_MAX_LANE_WIDTH // 128, 0, -1):
        c = 128 * k
        if n % c == 0:
            C = c
            break
    R = n // C
    x2 = x.reshape(R, C)
    y2 = y.reshape(R, C)

    # Row block: multiple of the dtype's sublane packing (8 f32 / 16 bf16 / 32 int8),
    # sized so one (tile_r, C) block is ~VMEM/16.  Blocks are balanced across the
    # grid (no nearly-empty tail), and we force >= 2 grid steps when R allows so the
    # "parallel" axis keeps both v7x TensorCores streaming.
    sublane = max(8, 32 // itemsize)
    bytes_per_row = C * itemsize
    rows_budget = max(
        sublane, (_target_block_bytes() // bytes_per_row) // sublane * sublane
    )
    num_blocks = _cdiv(R, rows_budget)
    if R >= 2 * sublane:
        num_blocks = max(num_blocks, 2)
    tile_r = min(R, _round_up(_cdiv(R, num_blocks), sublane))
    grid = (_cdiv(R, tile_r),)

    block_bytes = tile_r * C * itemsize
    # 3 arrays x 2 pipeline buffers, + 25% headroom for Mosaic internal scratch.
    vmem_limit = max(4 << 20, int(3 * 2 * block_bytes * 1.25))

    kwargs = {}
    if in_place:
        # Alias x (input 0) with the output buffer (caller must donate x). Saves the
        # output allocation; HBM traffic stays ~3N bytes since x is still read.
        kwargs["input_output_aliases"] = {0: 0}

    out2 = pl.pallas_call(
        _add_kernel,
        out_shape=jax.ShapeDtypeStruct((R, C), x2.dtype),
        grid=grid,
        in_specs=[
            pl.BlockSpec((tile_r, C), lambda i: (i, 0)),
            pl.BlockSpec((tile_r, C), lambda i: (i, 0)),
        ],
        out_specs=pl.BlockSpec((tile_r, C), lambda i: (i, 0)),
        compiler_params=pltpu.CompilerParams(
            dimension_semantics=("parallel",),
            vmem_limit_bytes=vmem_limit,
        ),
        **kwargs,
    )(x2, y2)

    return out2.reshape(orig_shape)


if __name__ == "__main__":
    key = jax.random.PRNGKey(0)
    kx, ky, ka, kb, kc, kd = jax.random.split(key, 6)

    # Kernel path: small lane-dense 2-D case (elementwise op -> shape choice is free).
    R, C = 256, 512
    x = jax.random.normal(kx, (R, C), dtype=jnp.float32)
    y = jax.random.normal(ky, (R, C), dtype=jnp.float32)
    out = jax.block_until_ready(cat_then_add(x, y))
    expected = y + x
    assert out.shape == expected.shape
    assert jnp.allclose(out, expected, atol=1e-6, rtol=1e-6), "mismatch vs reference"

    # Shapes matching the original PyTorch module's inputs: torch.randn(1) (tiny path).
    xs = jax.random.normal(ka, (1,), dtype=jnp.float32)
    ys = jax.random.normal(kb, (1,), dtype=jnp.float32)
    out_s = jax.block_until_ready(cat_then_add(xs, ys))
    assert jnp.allclose(out_s, ys + xs, atol=1e-6, rtol=1e-6), "mismatch (scalar case)"

    # Lane-awkward element count (not a multiple of 128) -> fused-XLA fallback path.
    xa = jax.random.normal(kc, (8, 1000), dtype=jnp.float32)
    ya = jax.random.normal(kd, (8, 1000), dtype=jnp.float32)
    out_a = jax.block_until_ready(cat_then_add(xa, ya))
    assert jnp.allclose(out_a, ya + xa, atol=1e-6, rtol=1e-6), "mismatch (awkward case)"

    print("KERNEL_OK")
</pallas_src>

<mosaic_0001>
module attributes {stable_mosaic.version = 11 : i64} {
  func.func @_add_kernel(%arg0: i32, %arg1: memref<8x8192xf32, #tpu.memory_space<vmem>>, %arg2: memref<8x8192xf32, #tpu.memory_space<vmem>>, %arg3: memref<8x8192xf32, #tpu.memory_space<vmem>>) attributes {dimension_semantics = [#tpu.dimension_semantics<parallel>], iteration_bounds = array<i64: 2>, scalar_prefetch = 0 : i64, scratch_operands = 0 : i64, tpu.core_type = #tpu.core_type<tc>, window_params = [{transform_indices = @transform_0, window_bounds = array<i64: 8, 8192>}, {transform_indices = @transform_1, window_bounds = array<i64: 8, 8192>}, {transform_indices = @transform_2, window_bounds = array<i64: 8, 8192>}]} {
    %c0 = arith.constant 0 : index
    %c0_0 = arith.constant 0 : index
    %0 = vector.load %arg2[%c0, %c0_0] : memref<8x8192xf32, #tpu.memory_space<vmem>>, vector<8x8192xf32>
    %c0_1 = arith.constant 0 : index
    %c0_2 = arith.constant 0 : index
    %1 = vector.load %arg1[%c0_1, %c0_2] : memref<8x8192xf32, #tpu.memory_space<vmem>>, vector<8x8192xf32>
    %2 = arith.addf %0, %1 : vector<8x8192xf32>
    %c0_3 = arith.constant 0 : index
    %c0_4 = arith.constant 0 : index
    %3 = vector.load %arg3[%c0_3, %c0_4] : memref<8x8192xf32, #tpu.memory_space<vmem>>, vector<8x8192xf32>
    tpu.vector_store %arg3[%c0_3, %c0_4], %2 {strides = array<i32>} : memref<8x8192xf32, #tpu.memory_space<vmem>>, vector<8x8192xf32>,
    return
  }
  func.func @transform_0(%arg0: i32) -> (i32, i32) {
    %c0_i32 = arith.constant 0 : i32
    %c0_i32_0 = arith.constant 0 : i32
    return %arg0, %c0_i32 : i32, i32
  }
  func.func @transform_1(%arg0: i32) -> (i32, i32) {
    %c0_i32 = arith.constant 0 : i32
    %c0_i32_0 = arith.constant 0 : i32
    return %arg0, %c0_i32 : i32, i32
  }
  func.func @transform_2(%arg0: i32) -> (i32, i32) {
    %c0_i32 = arith.constant 0 : i32
    %c0_i32_0 = arith.constant 0 : i32
    return %arg0, %c0_i32 : i32, i32
  }
}

</mosaic_0001>

<bundles_post_ra>
// kernel: tpu_custom_call.1
= control target key start
LH: loop header
LB: loop body
LE: loop exit
PB: predicated region body
PF: predicated region fallthrough
CT: control target
= control target key end

     0   :  { %7 = vsyncpa [#allocation3], 0  ;;  %s1192_s0 = inlined_call_operand.hbm [shape: f32[16,8192], index: 0, kind: input, shape index: {}]   ;;  %s1193_s1 = inlined_call_operand.hbm [shape: f32[16,8192], index: 1, kind: input, shape index: {}]   ;;  %s1194_s2 = inlined_call_operand.hbm [shape: f32[16,8192], index: 2, kind: output, shape index: {}]  }
   0x1   :  { %9 = vsyncpa [#allocation3 + $0x1], 0 }
   0x2   :  { %10 = vsyncpa [#allocation6], 0 }
   0x3   :  { %12 = vsyncpa [#allocation6 + $0x1], 0 }
   0x4   :  { %13 = vsyncpa [#allocation4], 0 }
   0x5   :  { %15 = vsyncpa [#allocation4 + $0x1], 0  ;;  %s784_s9 = smov 0   ;;  %s786_s10 = smov 0  }
   0x6   :  { %s788_s11 = smov 0   ;;  %s790_s12 = smov 0  }
   0x7 LB: > { %s805_s13 = sadd.s32 4294967295, %s764_s12   ;;  %s562_s14 = sadd.s32 4294967294, %s764_s12   ;;  %s764_s12 = sphi %s790_s12, %s1213_s12   ;;  %s760_s11 = sphi %s788_s11, %s1212_s11   ;;  %s756_s10 = sphi %s786_s10, %s1211_s10   ;;  %s752_s9 = sphi %s784_s9, %s1210_s9  }
   0x8   : > { %s809_s15 = sadd.s32 1, %s764_s12   ;;  %s28_s16 = sadd.s32 1, %s760_s11 }
   0x9   : > { %s25_s17 = ssub.s32 %s764_s12, %s809_s15  ;;  %p35_p0 = scmp.ne.s32.totalorder %s760_s11, %s756_s10 }
   0xa   : > { %p26_p1 = scmp.eq.s32.totalorder %s25_s17, 0  ;;  %p36_p2 = scmp.eq.s32.totalorder %s764_s12, 0 }
   0xb   : > { %p41_p3 = scmp.ne.s32.totalorder %s756_s10, %s752_s9  ;;  %p42_p4 = scmp.eq.s32.totalorder %s805_s13, 0 }
   0xc   : > { %s821_s18 = scalar_select %p26_p1, %s760_s11, %s28_s16  }
   0xd   : > { %p823_p5 = por %p36_p2, %p35_p0  ;;  %p827_p6 = por %p42_p4, %p41_p3 }
   0xe   : > { %p91_p7 = scmp.eq.s32.totalorder %s805_s13, 1  ;;  %p97_p8 = scmp.eq.s32.totalorder %s562_s14, 1 }
   0xf   : > { %s1198_s20 = scalar_select %p827_p6, 1, 0 }
  0x10   : > { %p600_p10 = scmp.lt.s32.totalorder %s764_s12, 2  ;;  %p834_p11 = por %p91_p7, %p35_p0 }
  0x11   : > { %p838_p12 = por %p97_p8, %p41_p3  ;;  %s843_s23 = sand.u32 1, %s760_s11  }
  0x12   : > { %s1199_s21 = scalar_select %p834_p11, 1, 0 }
  0x13   : > { %s1200_s22 = scalar_select %p838_p12, 1, 0 }
  0x14   : > { %s580_s24 = sshll.u32 %s764_s12, 13  ;;  %s565_s25 = sshll.u32 %s843_s23, 9 }
  0x15   : > { %s852_s28 = scalar_lea.hbm %s1192_s0, %s580_s24  ;;  %s121_s29 = scalar_lea.vmem [#allocation2], %s565_s25 }
  0x16   : > { %s129_s30 = sshll.u32 %s121_s29, 4  ;;  %p858_p13 = pnand %p600_p10, %p823_p5  ;;  %s862_s30 = int_to_ptr.vmem [resolvable:$true] %s129_s30 }
  0x17   : > { %s118_s4 = scalar_lea.sflag [#allocation3], %s843_s23  ;;  %s634_s5 = scalar_lea.hbm %s852_s28, 8192 }
  0x18   : > { %p635_p2 = scmp.ne.s32.totalorder %s852_s28, %s634_s5  ;;  %p636_p3 = pneg %p858_p13 }
  0x19   : > { %s639_s8 = scalar_lea.hbm %s1192_s0, 16384  ;;  %p640_p5 = scmp.lt.u32.totalorder %s852_s28, %s1192_s0 }
  0x1a   : > { %p637_p4 = pnand %p636_p3, %p635_p2  ;;  %p641_p8 = scmp.lt.u32.totalorder %s639_s8, %s634_s5 }
  0x1b   : > { %p643_p9 = scmp.lt.u32.totalorder %s634_s5, %s852_s28 }
  0x1c   : > { %p638_p7 = pneg %p637_p4  ;;  %p642_p10 = por %p641_p8, %p640_p5 }
  0x1e   : > { %p644_p0 = por %p643_p9, %p642_p10 }
  0x20   : > { %p645_p1 = pnand %p644_p0, %p638_p7 }
  0x22   : > { %648 = shalt.err (!%p645_p1)
}
  0x23   : > { %s649_s17 = scalar_lea.vmem %s862_s30, 8192  ;;  %s766_s19 = smov [#allocation2]  }
  0x24   : > { %p650_p2 = scmp.ne.s32.totalorder %s862_s30, %s649_s17  ;;  %s654_s26 = sshll.u32 %s766_s19, 4  ;;  %s655_s26 = int_to_ptr.vmem [resolvable:$false] %s654_s26 }
  0x25   : > { %s656_s27 = scalar_lea.vmem %s655_s26, 16384  ;;  %p657_p11 = scmp.lt.s32.totalorder %s862_s30, %s655_s26 }
  0x26   : > { %p652_p4 = pnand %p650_p2, %p636_p3  ;;  %p658_p5 = scmp.lt.s32.totalorder %s656_s27, %s649_s17 }
  0x28   : > { %p653_p12 = pneg %p652_p4  ;;  %p659_p8 = por %p658_p5, %p657_p11 }
  0x2a   : > { %p660_p9 = pnand %p659_p8, %p653_p12 }
  0x2c   : > { %663 = shalt.err (!%p660_p9)
}
  0x2d   : > { %592 = dma.hbm_to_vmem [thread:$0]  (!%p858_p13), %s852_s28, 8192, %s862_s30, %s118_s4  }
  0x2e   : > { %p1202_p0 = scmp.lt.s32.totalorder %s764_s12, 3  ;;  %p1203_p1 = scmp.ge.s32.totalorder %s764_s12, 1 }
  0x2f   : > { %s905_s7 = scalar_lea.hbm %s1193_s1, %s580_s24  ;;  %s140_s8 = scalar_lea.vmem [#allocation5], %s565_s25 }
  0x30   : > { %p896_p7 = pnand %p1203_p1, %p1202_p0  ;;  %s148_s14 = sshll.u32 %s140_s8, 4  ;;  %s149_s14 = int_to_ptr.vmem [resolvable:$true] %s148_s14 }
  0x31   : > { %s137_s28 = scalar_lea.sflag [#allocation6], %s843_s23  ;;  %s664_s30 = scalar_lea.hbm %s905_s7, 8192 }
  0x32   : > { %s1204_s29 = scalar_select %p896_p7, 1, 0 }
  0x33   : > { %p665_p11 = scmp.ne.s32.totalorder %s905_s7, %s664_s30  ;;  %s669_s24 = scalar_lea.hbm %s1193_s1, 16384 }
  0x34   : > { %p670_p2 = scmp.lt.u32.totalorder %s905_s7, %s1193_s1  ;;  %p671_p4 = scmp.lt.u32.totalorder %s669_s24, %s664_s30 }
  0x35   : > { %p667_p12 = pnand %p665_p11, %p636_p3  ;;  %p673_p8 = scmp.lt.u32.totalorder %s664_s30, %s905_s7 }
  0x36   : > { %p672_p5 = por %p671_p4, %p670_p2 }
  0x37   : > { %p668_p10 = pneg %p667_p12 }
  0x38   : > { %p674_p9 = por %p673_p8, %p672_p5 }
  0x3a   : > { %p675_p0 = pnand %p674_p9, %p668_p10 }
  0x3c   : > { %678 = shalt.err (!%p675_p0)
}
  0x3d   : > { %s679_s23 = scalar_lea.vmem %s149_s14, 8192  ;;  %s767_s25 = smov [#allocation5]  }
  0x3e   : > { %p680_p1 = scmp.ne.s32.totalorder %s149_s14, %s679_s23  ;;  %s684_s26 = sshll.u32 %s767_s25, 4  ;;  %s685_s26 = int_to_ptr.vmem [resolvable:$false] %s684_s26 }
  0x3f   : > { %s686_s27 = scalar_lea.vmem %s685_s26, 16384  ;;  %p687_p6 = scmp.lt.s32.totalorder %s149_s14, %s685_s26 }
  0x40   : > { %p682_p11 = pnand %p680_p1, %p636_p3  ;;  %p688_p7 = scmp.lt.s32.totalorder %s686_s27, %s679_s23 }
  0x42   : > { %p683_p12 = pneg %p682_p11  ;;  %p689_p2 = por %p688_p7, %p687_p6 }
  0x44   : > { %p690_p4 = pnand %p689_p2, %p683_p12 }
  0x46   : > { %693 = shalt.err (!%p690_p4)
}
  0x47   : > { %595 = dma.hbm_to_vmem [thread:$0]  (!%p858_p13), %s905_s7, 8192, %s149_s14, %s137_s28  }
  0x48   : > { %p1205_p10 = scmp.ne.s32.totalorder %s1204_s29, 0 }
  0x49   : > { %s932_s5 = sand.u32 (!%p1205_p10), 1, %s756_s10   ;;  %p1206_p6 = scmp.ne.s32.totalorder (!%p1205_p10), %s1198_s20, 0 }
  0x4a   : > { %157 = sbr.rel (%p1205_p10) target bundleno = 151 (0x97), region = 28  ;;  %s572_s6 = sshll.u32 (!%p1205_p10), %s932_s5, 9 }
  0x4b   : > { %s160_s8 = scalar_lea.sflag (!%p1205_p10), [#allocation3], %s932_s5  ;;  %s936_s30 = scalar_lea.vmem (!%p1205_p10), [#allocation2], %s572_s6 }
  0x51   : > { %739 = dma.done.wait (%p1206_p6), %s160_s8, 8192  }
  0x52   : > { %741 = vsyncadd (%p1206_p6), %s160_s8, 4294959104  ;;  %s169_s3 = scalar_lea.sflag [#allocation6], %s932_s5  ;;  %s943_s29 = scalar_lea.vmem [#allocation5], %s572_s6 }
  0x53   : > { %743 = dma.done.wait (%p1206_p6), %s169_s3, 8192  }
  0x54   : > { %745 = vsyncadd (%p1206_p6), %s169_s3, 4294959104  ;;  %v198_v0 = vld [vmem:[%s943_s29] sm:$0xff]  ;;  %v199_v2 = vld [vmem:[%s943_s29 + $0x8] sm:$0xff]  ;;  %s958_s20 = scalar_lea.vmem [#allocation7], %s572_s6  ;;  %s582_s7 = sshll.u32 %s805_s13, 13 }
  0x55   : > { %v262_v1 = vld [vmem:[%s936_s30] sm:$0xff]  ;;  %v263_v4 = vld [vmem:[%s936_s30 + $0x8] sm:$0xff]  ;;  %v200_v5 = vld [vmem:[%s943_s29 + $0x10] sm:$0xff]  ;;  %s469_s14 = sshll.u32 %s958_s20, 4  ;;  %s1145_s4 = scalar_lea.hbm %s1194_s2, %s582_s7  ;;  %s1147_s14 = int_to_ptr.vmem [resolvable:$true] %s469_s14 }
  0x56   : > { %v326_v3 = vadd.f32 %v262_v1, %v198_v0  ;;  %v264_v6 = vld [vmem:[%s936_s30 + $0x10] sm:$0xff]  ;;  %v327_v7 = vadd.f32 %v263_v4, %v199_v2  ;;  %v201_v9 = vld [vmem:[%s943_s29 + $0x18] sm:$0xff]  ;;  %v202_v11 = vld [vmem:[%s943_s29 + $0x20] sm:$0xff]  ;;  %s455_s16 = scalar_lea.sflag [#allocation4], %s932_s5  ;;  %s694_s24 = scalar_lea.vmem %s1147_s14, 8192 }
  0x57   : > { %v328_v8 = vadd.f32 %v264_v6, %v200_v5  ;;  %v265_v10 = vld [vmem:[%s936_s30 + $0x18] sm:$0xff]  ;;  %v266_v13 = vld [vmem:[%s936_s30 + $0x20] sm:$0xff]  ;;  %v203_v14 = vld [vmem:[%s943_s29 + $0x28] sm:$0xff]  ;;  %p695_p13 = scmp.ne.s32.totalorder %s1147_s14, %s694_s24  ;;  %p1207_p3 = scmp.ne.s32.totalorder %s1199_s21, 0 }
  0x58   : > { %390 = vst [vmem:[%s958_s20] sm:$0xff] %v326_v3  ;;  %v329_v12 = vadd.f32 %v265_v10, %v201_v9  ;;  %v267_v15 = vld [vmem:[%s936_s30 + $0x28] sm:$0xff]  ;;  %391 = vst [vmem:[%s958_s20 + $0x8] sm:$0xff] %v327_v7  ;;  %v330_v16 = vadd.f32 %v266_v13, %v202_v11  ;;  %v204_v18 = vld [vmem:[%s943_s29 + $0x30] sm:$0xff]  ;;  %s768_s17 = smov [#allocation7]  }
  0x59   : > { %392 = vst [vmem:[%s958_s20 + $0x10] sm:$0xff] %v328_v8  ;;  %v331_v17 = vadd.f32 %v267_v15, %v203_v14  ;;  %v268_v19 = vld [vmem:[%s936_s30 + $0x30] sm:$0xff]  ;;  %v205_v20 = vld [vmem:[%s943_s29 + $0x38] sm:$0xff]  ;;  %v206_v23 = vld [vmem:[%s943_s29 + $0x40] sm:$0xff]  ;;  %p696_p7 = pnand %p695_p13, %p1207_p3  ;;  %s698_s19 = sshll.u32 %s768_s17, 4  ;;  %s699_s19 = int_to_ptr.vmem [resolvable:$false] %s698_s19 }
  0x5a   : > { %393 = vst [vmem:[%s958_s20 + $0x18] sm:$0xff] %v329_v12  ;;  %v332_v21 = vadd.f32 %v268_v19, %v204_v18  ;;  %v269_v22 = vld [vmem:[%s936_s30 + $0x38] sm:$0xff]  ;;  %v270_v24 = vld [vmem:[%s936_s30 + $0x40] sm:$0xff]  ;;  %394 = vst [vmem:[%s958_s20 + $0x20] sm:$0xff] %v330_v16  ;;  %s700_s23 = scalar_lea.vmem %s699_s19, 16384  ;;  %p701_p8 = scmp.lt.s32.totalorder %s1147_s14, %s699_s19 }
  0x5b   : > { %395 = vst [vmem:[%s958_s20 + $0x28] sm:$0xff] %v331_v17  ;;  %v333_v25 = vadd.f32 %v269_v22, %v205_v20  ;;  %v334_v26 = vadd.f32 %v270_v24, %v206_v23  ;;  %v207_v27 = vld [vmem:[%s943_s29 + $0x48] sm:$0xff]  ;;  %v208_v29 = vld [vmem:[%s943_s29 + $0x50] sm:$0xff]  ;;  %v209_v32 = vld [vmem:[%s943_s29 + $0x58] sm:$0xff]  ;;  %p697_p5 = pneg %p696_p7  ;;  %p702_p9 = scmp.lt.s32.totalorder %s700_s23, %s694_s24 }
  0x5c   : > { %v271_v28 = vld [vmem:[%s936_s30 + $0x48] sm:$0xff]  ;;  %396 = vst [vmem:[%s958_s20 + $0x30] sm:$0xff] %v332_v21  ;;  %v272_v31 = vld [vmem:[%s936_s30 + $0x50] sm:$0xff]  ;;  %v273_v33 = vld [vmem:[%s936_s30 + $0x58] sm:$0xff] }
  0x5d   : > { %v335_v30 = vadd.f32 %v271_v28, %v207_v27  ;;  %397 = vst [vmem:[%s958_s20 + $0x38] sm:$0xff] %v333_v25  ;;  %398 = vst [vmem:[%s958_s20 + $0x40] sm:$0xff] %v334_v26  ;;  %v336_v34 = vadd.f32 %v272_v31, %v208_v29  ;;  %v337_v35 = vadd.f32 %v273_v33, %v209_v32  ;;  %v210_v36 = vld [vmem:[%s943_s29 + $0x60] sm:$0xff]  ;;  %v211_v38 = vld [vmem:[%s943_s29 + $0x68] sm:$0xff]  ;;  %p703_p0 = por %p702_p9, %p701_p8 }
  0x5e   : > { %v274_v37 = vld [vmem:[%s936_s30 + $0x60] sm:$0xff]  ;;  %v275_v40 = vld [vmem:[%s936_s30 + $0x68] sm:$0xff]  ;;  %v212_v41 = vld [vmem:[%s943_s29 + $0x70] sm:$0xff] }
  0x5f   : > { %399 = vst [vmem:[%s958_s20 + $0x48] sm:$0xff] %v335_v30  ;;  %v338_v39 = vadd.f32 %v274_v37, %v210_v36  ;;  %v276_v42 = vld [vmem:[%s936_s30 + $0x70] sm:$0xff]  ;;  %400 = vst [vmem:[%s958_s20 + $0x50] sm:$0xff] %v336_v34  ;;  %v339_v43 = vadd.f32 %v275_v40, %v211_v38  ;;  %v213_v45 = vld [vmem:[%s943_s29 + $0x78] sm:$0xff]  ;;  %p704_p1 = pnand %p703_p0, %p697_p5 }
  0x60   : > { %401 = vst [vmem:[%s958_s20 + $0x58] sm:$0xff] %v337_v35  ;;  %v340_v44 = vadd.f32 %v276_v42, %v212_v41  ;;  %v277_v46 = vld [vmem:[%s936_s30 + $0x78] sm:$0xff]  ;;  %v214_v47 = vld [vmem:[%s943_s29 + $0x80] sm:$0xff]  ;;  %v215_v50 = vld [vmem:[%s943_s29 + $0x88] sm:$0xff] }
  0x61   : > { %402 = vst [vmem:[%s958_s20 + $0x60] sm:$0xff] %v338_v39  ;;  %v341_v48 = vadd.f32 %v277_v46, %v213_v45  ;;  %v278_v49 = vld [vmem:[%s936_s30 + $0x80] sm:$0xff]  ;;  %v279_v51 = vld [vmem:[%s936_s30 + $0x88] sm:$0xff]  ;;  %403 = vst [vmem:[%s958_s20 + $0x68] sm:$0xff] %v339_v43 }
  0x62   : > { %404 = vst [vmem:[%s958_s20 + $0x70] sm:$0xff] %v340_v44  ;;  %v342_v52 = vadd.f32 %v278_v49, %v214_v47  ;;  %v343_v53 = vadd.f32 %v279_v51, %v215_v50  ;;  %v216_v54 = vld [vmem:[%s943_s29 + $0x90] sm:$0xff]  ;;  %v217_v56 = vld [vmem:[%s943_s29 + $0x98] sm:$0xff]  ;;  %v218_v59 = vld [vmem:[%s943_s29 + $0xa0] sm:$0xff] }
  0x63   : > { %v280_v55 = vld [vmem:[%s936_s30 + $0x90] sm:$0xff]  ;;  %405 = vst [vmem:[%s958_s20 + $0x78] sm:$0xff] %v341_v48  ;;  %v281_v58 = vld [vmem:[%s936_s30 + $0x98] sm:$0xff]  ;;  %v282_v60 = vld [vmem:[%s936_s30 + $0xa0] sm:$0xff] }
  0x64   : > { %v344_v57 = vadd.f32 %v280_v55, %v216_v54  ;;  %406 = vst [vmem:[%s958_s20 + $0x80] sm:$0xff] %v342_v52  ;;  %407 = vst [vmem:[%s958_s20 + $0x88] sm:$0xff] %v343_v53  ;;  %v345_v61 = vadd.f32 %v281_v58, %v217_v56  ;;  %v346_v62 = vadd.f32 %v282_v60, %v218_v59  ;;  %v219_v63 = vld [vmem:[%s943_s29 + $0xa8] sm:$0xff]  ;;  %v220_v1 = vld [vmem:[%s943_s29 + $0xb0] sm:$0xff] }
  0x65   : > { %v283_v0 = vld [vmem:[%s936_s30 + $0xa8] sm:$0xff]  ;;  %v284_v3 = vld [vmem:[%s936_s30 + $0xb0] sm:$0xff]  ;;  %v221_v4 = vld [vmem:[%s943_s29 + $0xb8] sm:$0xff] }
  0x66   : > { %408 = vst [vmem:[%s958_s20 + $0x90] sm:$0xff] %v344_v57  ;;  %v347_v2 = vadd.f32 %v283_v0, %v219_v63  ;;  %v285_v5 = vld [vmem:[%s936_s30 + $0xb8] sm:$0xff]  ;;  %409 = vst [vmem:[%s958_s20 + $0x98] sm:$0xff] %v345_v61  ;;  %v348_v6 = vadd.f32 %v284_v3, %v220_v1  ;;  %v222_v8 = vld [vmem:[%s943_s29 + $0xc0] sm:$0xff] }
  0x67   : > { %410 = vst [vmem:[%s958_s20 + $0xa0] sm:$0xff] %v346_v62  ;;  %v349_v7 = vadd.f32 %v285_v5, %v221_v4  ;;  %v286_v9 = vld [vmem:[%s936_s30 + $0xc0] sm:$0xff]  ;;  %v223_v10 = vld [vmem:[%s943_s29 + $0xc8] sm:$0xff]  ;;  %v224_v13 = vld [vmem:[%s943_s29 + $0xd0] sm:$0xff] }
  0x68   : > { %411 = vst [vmem:[%s958_s20 + $0xa8] sm:$0xff] %v347_v2  ;;  %v350_v11 = vadd.f32 %v286_v9, %v222_v8  ;;  %v287_v12 = vld [vmem:[%s936_s30 + $0xc8] sm:$0xff]  ;;  %v288_v14 = vld [vmem:[%s936_s30 + $0xd0] sm:$0xff]  ;;  %412 = vst [vmem:[%s958_s20 + $0xb0] sm:$0xff] %v348_v6 }
  0x69   : > { %413 = vst [vmem:[%s958_s20 + $0xb8] sm:$0xff] %v349_v7  ;;  %v351_v15 = vadd.f32 %v287_v12, %v223_v10  ;;  %v352_v16 = vadd.f32 %v288_v14, %v224_v13  ;;  %v225_v17 = vld [vmem:[%s943_s29 + $0xd8] sm:$0xff]  ;;  %v226_v19 = vld [vmem:[%s943_s29 + $0xe0] sm:$0xff]  ;;  %v227_v22 = vld [vmem:[%s943_s29 + $0xe8] sm:$0xff] }
  0x6a   : > { %v289_v18 = vld [vmem:[%s936_s30 + $0xd8] sm:$0xff]  ;;  %414 = vst [vmem:[%s958_s20 + $0xc0] sm:$0xff] %v350_v11  ;;  %v290_v21 = vld [vmem:[%s936_s30 + $0xe0] sm:$0xff]  ;;  %v291_v23 = vld [vmem:[%s936_s30 + $0xe8] sm:$0xff] }
  0x6b   : > { %v353_v20 = vadd.f32 %v289_v18, %v225_v17  ;;  %415 = vst [vmem:[%s958_s20 + $0xc8] sm:$0xff] %v351_v15  ;;  %416 = vst [vmem:[%s958_s20 + $0xd0] sm:$0xff] %v352_v16  ;;  %v354_v24 = vadd.f32 %v290_v21, %v226_v19  ;;  %v355_v25 = vadd.f32 %v291_v23, %v227_v22  ;;  %v228_v26 = vld [vmem:[%s943_s29 + $0xf0] sm:$0xff]  ;;  %v229_v28 = vld [vmem:[%s943_s29 + $0xf8] sm:$0xff] }
  0x6c   : > { %v292_v27 = vld [vmem:[%s936_s30 + $0xf0] sm:$0xff]  ;;  %v293_v30 = vld [vmem:[%s936_s30 + $0xf8] sm:$0xff]  ;;  %v230_v31 = vld [vmem:[%s943_s29 + $0x100] sm:$0xff] }
  0x6d   : > { %417 = vst [vmem:[%s958_s20 + $0xd8] sm:$0xff] %v353_v20  ;;  %v356_v29 = vadd.f32 %v292_v27, %v228_v26  ;;  %v294_v32 = vld [vmem:[%s936_s30 + $0x100] sm:$0xff]  ;;  %418 = vst [vmem:[%s958_s20 + $0xe0] sm:$0xff] %v354_v24  ;;  %v357_v33 = vadd.f32 %v293_v30, %v229_v28  ;;  %v231_v35 = vld [vmem:[%s943_s29 + $0x108] sm:$0xff] }
  0x6e   : > { %419 = vst [vmem:[%s958_s20 + $0xe8] sm:$0xff] %v355_v25  ;;  %v358_v34 = vadd.f32 %v294_v32, %v230_v31  ;;  %v295_v36 = vld [vmem:[%s936_s30 + $0x108] sm:$0xff]  ;;  %v232_v37 = vld [vmem:[%s943_s29 + $0x110] sm:$0xff]  ;;  %v233_v40 = vld [vmem:[%s943_s29 + $0x118] sm:$0xff] }
  0x6f   : > { %420 = vst [vmem:[%s958_s20 + $0xf0] sm:$0xff] %v356_v29  ;;  %v359_v38 = vadd.f32 %v295_v36, %v231_v35  ;;  %v296_v39 = vld [vmem:[%s936_s30 + $0x110] sm:$0xff]  ;;  %v297_v41 = vld [vmem:[%s936_s30 + $0x118] sm:$0xff]  ;;  %421 = vst [vmem:[%s958_s20 + $0xf8] sm:$0xff] %v357_v33 }
  0x70   : > { %422 = vst [vmem:[%s958_s20 + $0x100] sm:$0xff] %v358_v34  ;;  %v360_v42 = vadd.f32 %v296_v39, %v232_v37  ;;  %v361_v43 = vadd.f32 %v297_v41, %v233_v40  ;;  %v234_v44 = vld [vmem:[%s943_s29 + $0x120] sm:$0xff]  ;;  %v235_v46 = vld [vmem:[%s943_s29 + $0x128] sm:$0xff]  ;;  %v236_v49 = vld [vmem:[%s943_s29 + $0x130] sm:$0xff] }
  0x71   : > { %v298_v45 = vld [vmem:[%s936_s30 + $0x120] sm:$0xff]  ;;  %423 = vst [vmem:[%s958_s20 + $0x108] sm:$0xff] %v359_v38  ;;  %v299_v48 = vld [vmem:[%s936_s30 + $0x128] sm:$0xff]  ;;  %v300_v50 = vld [vmem:[%s936_s30 + $0x130] sm:$0xff] }
  0x72   : > { %v362_v47 = vadd.f32 %v298_v45, %v234_v44  ;;  %424 = vst [vmem:[%s958_s20 + $0x110] sm:$0xff] %v360_v42  ;;  %425 = vst [vmem:[%s958_s20 + $0x118] sm:$0xff] %v361_v43  ;;  %v363_v51 = vadd.f32 %v299_v48, %v235_v46  ;;  %v364_v52 = vadd.f32 %v300_v50, %v236_v49  ;;  %v237_v53 = vld [vmem:[%s943_s29 + $0x138] sm:$0xff]  ;;  %v238_v55 = vld [vmem:[%s943_s29 + $0x140] sm:$0xff] }
  0x73   : > { %v301_v54 = vld [vmem:[%s936_s30 + $0x138] sm:$0xff]  ;;  %v302_v57 = vld [vmem:[%s936_s30 + $0x140] sm:$0xff]  ;;  %v239_v58 = vld [vmem:[%s943_s29 + $0x148] sm:$0xff] }
  0x74   : > { %426 = vst [vmem:[%s958_s20 + $0x120] sm:$0xff] %v362_v47  ;;  %v365_v56 = vadd.f32 %v301_v54, %v237_v53  ;;  %v303_v59 = vld [vmem:[%s936_s30 + $0x148] sm:$0xff]  ;;  %427 = vst [vmem:[%s958_s20 + $0x128] sm:$0xff] %v363_v51  ;;  %v366_v60 = vadd.f32 %v302_v57, %v238_v55  ;;  %v240_v62 = vld [vmem:[%s943_s29 + $0x150] sm:$0xff] }
  0x75   : > { %428 = vst [vmem:[%s958_s20 + $0x130] sm:$0xff] %v364_v52  ;;  %v367_v61 = vadd.f32 %v303_v59, %v239_v58  ;;  %v304_v63 = vld [vmem:[%s936_s30 + $0x150] sm:$0xff]  ;;  %v241_v0 = vld [vmem:[%s943_s29 + $0x158] sm:$0xff]  ;;  %v242_v3 = vld [vmem:[%s943_s29 + $0x160] sm:$0xff] }
  0x76   : > { %429 = vst [vmem:[%s958_s20 + $0x138] sm:$0xff] %v365_v56  ;;  %v368_v1 = vadd.f32 %v304_v63, %v240_v62  ;;  %v305_v2 = vld [vmem:[%s936_s30 + $0x158] sm:$0xff]  ;;  %v306_v4 = vld [vmem:[%s936_s30 + $0x160] sm:$0xff]  ;;  %430 = vst [vmem:[%s958_s20 + $0x140] sm:$0xff] %v366_v60 }
  0x77   : > { %431 = vst [vmem:[%s958_s20 + $0x148] sm:$0xff] %v367_v61  ;;  %v369_v5 = vadd.f32 %v305_v2, %v241_v0  ;;  %v370_v6 = vadd.f32 %v306_v4, %v242_v3  ;;  %v243_v7 = vld [vmem:[%s943_s29 + $0x168] sm:$0xff]  ;;  %v244_v9 = vld [vmem:[%s943_s29 + $0x170] sm:$0xff]  ;;  %v245_v12 = vld [vmem:[%s943_s29 + $0x178] sm:$0xff] }
  0x78   : > { %v307_v8 = vld [vmem:[%s936_s30 + $0x168] sm:$0xff]  ;;  %432 = vst [vmem:[%s958_s20 + $0x150] sm:$0xff] %v368_v1  ;;  %v308_v11 = vld [vmem:[%s936_s30 + $0x170] sm:$0xff]  ;;  %v309_v13 = vld [vmem:[%s936_s30 + $0x178] sm:$0xff] }
  0x79   : > { %v371_v10 = vadd.f32 %v307_v8, %v243_v7  ;;  %433 = vst [vmem:[%s958_s20 + $0x158] sm:$0xff] %v369_v5  ;;  %434 = vst [vmem:[%s958_s20 + $0x160] sm:$0xff] %v370_v6  ;;  %v372_v14 = vadd.f32 %v308_v11, %v244_v9  ;;  %v373_v15 = vadd.f32 %v309_v13, %v245_v12  ;;  %v246_v16 = vld [vmem:[%s943_s29 + $0x180] sm:$0xff]  ;;  %v247_v18 = vld [vmem:[%s943_s29 + $0x188] sm:$0xff] }
  0x7a   : > { %v310_v17 = vld [vmem:[%s936_s30 + $0x180] sm:$0xff]  ;;  %v311_v20 = vld [vmem:[%s936_s30 + $0x188] sm:$0xff]  ;;  %v248_v21 = vld [vmem:[%s943_s29 + $0x190] sm:$0xff] }
  0x7b   : > { %435 = vst [vmem:[%s958_s20 + $0x168] sm:$0xff] %v371_v10  ;;  %v374_v19 = vadd.f32 %v310_v17, %v246_v16  ;;  %v312_v22 = vld [vmem:[%s936_s30 + $0x190] sm:$0xff]  ;;  %436 = vst [vmem:[%s958_s20 + $0x170] sm:$0xff] %v372_v14  ;;  %v375_v23 = vadd.f32 %v311_v20, %v247_v18  ;;  %v249_v25 = vld [vmem:[%s943_s29 + $0x198] sm:$0xff] }
  0x7c   : > { %437 = vst [vmem:[%s958_s20 + $0x178] sm:$0xff] %v373_v15  ;;  %v376_v24 = vadd.f32 %v312_v22, %v248_v21  ;;  %v313_v26 = vld [vmem:[%s936_s30 + $0x198] sm:$0xff]  ;;  %v250_v27 = vld [vmem:[%s943_s29 + $0x1a0] sm:$0xff]  ;;  %v251_v30 = vld [vmem:[%s943_s29 + $0x1a8] sm:$0xff] }
  0x7d   : > { %438 = vst [vmem:[%s958_s20 + $0x180] sm:$0xff] %v374_v19  ;;  %v377_v28 = vadd.f32 %v313_v26, %v249_v25  ;;  %v314_v29 = vld [vmem:[%s936_s30 + $0x1a0] sm:$0xff]  ;;  %v315_v31 = vld [vmem:[%s936_s30 + $0x1a8] sm:$0xff]  ;;  %439 = vst [vmem:[%s958_s20 + $0x188] sm:$0xff] %v375_v23 }
  0x7e   : > { %440 = vst [vmem:[%s958_s20 + $0x190] sm:$0xff] %v376_v24  ;;  %v378_v32 = vadd.f32 %v314_v29, %v250_v27  ;;  %v379_v33 = vadd.f32 %v315_v31, %v251_v30  ;;  %v252_v34 = vld [vmem:[%s943_s29 + $0x1b0] sm:$0xff]  ;;  %v253_v36 = vld [vmem:[%s943_s29 + $0x1b8] sm:$0xff]  ;;  %v254_v39 = vld [vmem:[%s943_s29 + $0x1c0] sm:$0xff] }
  0x7f   : > { %v316_v35 = vld [vmem:[%s936_s30 + $0x1b0] sm:$0xff]  ;;  %441 = vst [vmem:[%s958_s20 + $0x198] sm:$0xff] %v377_v28  ;;  %v317_v38 = vld [vmem:[%s936_s30 + $0x1b8] sm:$0xff]  ;;  %v318_v40 = vld [vmem:[%s936_s30 + $0x1c0] sm:$0xff] }
  0x80   : > { %v380_v37 = vadd.f32 %v316_v35, %v252_v34  ;;  %442 = vst [vmem:[%s958_s20 + $0x1a0] sm:$0xff] %v378_v32  ;;  %443 = vst [vmem:[%s958_s20 + $0x1a8] sm:$0xff] %v379_v33  ;;  %v381_v41 = vadd.f32 %v317_v38, %v253_v36  ;;  %v382_v42 = vadd.f32 %v318_v40, %v254_v39  ;;  %v255_v43 = vld [vmem:[%s943_s29 + $0x1c8] sm:$0xff]  ;;  %v256_v45 = vld [vmem:[%s943_s29 + $0x1d0] sm:$0xff] }
  0x81   : > { %v319_v44 = vld [vmem:[%s936_s30 + $0x1c8] sm:$0xff]  ;;  %v320_v47 = vld [vmem:[%s936_s30 + $0x1d0] sm:$0xff]  ;;  %v257_v48 = vld [vmem:[%s943_s29 + $0x1d8] sm:$0xff] }
  0x82   : > { %444 = vst [vmem:[%s958_s20 + $0x1b0] sm:$0xff] %v380_v37  ;;  %v383_v46 = vadd.f32 %v319_v44, %v255_v43  ;;  %v321_v49 = vld [vmem:[%s936_s30 + $0x1d8] sm:$0xff]  ;;  %445 = vst [vmem:[%s958_s20 + $0x1b8] sm:$0xff] %v381_v41  ;;  %v384_v50 = vadd.f32 %v320_v47, %v256_v45  ;;  %v258_v52 = vld [vmem:[%s943_s29 + $0x1e0] sm:$0xff] }
  0x83   : > { %446 = vst [vmem:[%s958_s20 + $0x1c0] sm:$0xff] %v382_v42  ;;  %v385_v51 = vadd.f32 %v321_v49, %v257_v48  ;;  %v322_v53 = vld [vmem:[%s936_s30 + $0x1e0] sm:$0xff]  ;;  %v259_v54 = vld [vmem:[%s943_s29 + $0x1e8] sm:$0xff]  ;;  %v260_v57 = vld [vmem:[%s943_s29 + $0x1f0] sm:$0xff] }
  0x84   : > { %447 = vst [vmem:[%s958_s20 + $0x1c8] sm:$0xff] %v383_v46  ;;  %v386_v55 = vadd.f32 %v322_v53, %v258_v52  ;;  %v323_v56 = vld [vmem:[%s936_s30 + $0x1e8] sm:$0xff]  ;;  %v324_v58 = vld [vmem:[%s936_s30 + $0x1f0] sm:$0xff]  ;;  %448 = vst [vmem:[%s958_s20 + $0x1d0] sm:$0xff] %v384_v50 }
  0x85   : > { %449 = vst [vmem:[%s958_s20 + $0x1d8] sm:$0xff] %v385_v51  ;;  %v387_v59 = vadd.f32 %v323_v56, %v259_v54  ;;  %v388_v60 = vadd.f32 %v324_v58, %v260_v57  ;;  %v261_v61 = vld [vmem:[%s943_s29 + $0x1f8] sm:$0xff] }
  0x86   : > { %v325_v62 = vld [vmem:[%s936_s30 + $0x1f8] sm:$0xff]  ;;  %450 = vst [vmem:[%s958_s20 + $0x1e0] sm:$0xff] %v386_v55 }
  0x87   : > { %v389_v63 = vadd.f32 %v325_v62, %v261_v61  ;;  %451 = vst [vmem:[%s958_s20 + $0x1e8] sm:$0xff] %v387_v59  ;;  %452 = vst [vmem:[%s958_s20 + $0x1f0] sm:$0xff] %v388_v60 }
  0x89   : > { %453 = vst [vmem:[%s958_s20 + $0x1f8] sm:$0xff] %v389_v63 }
  0x8a   : > { %707 = shalt.err (!%p704_p1)
}
  0x8b   : > { %s708_s25 = scalar_lea.hbm %s1145_s4, 8192  ;;  %s712_s5 = scalar_lea.hbm %s1194_s2, 16384 }
  0x8c   : > { %p709_p11 = scmp.ne.s32.totalorder %s1145_s4, %s708_s25  ;;  %p713_p4 = scmp.lt.u32.totalorder %s1145_s4, %s1194_s2 }
  0x8d   : > { %p714_p10 = scmp.lt.u32.totalorder %s712_s5, %s708_s25  ;;  %p716_p13 = scmp.lt.u32.totalorder %s708_s25, %s1145_s4 }
  0x8e   : > { %p710_p12 = pnand %p709_p11, %p1207_p3 }
  0x8f   : > { %p715_p6 = por %p714_p10, %p713_p4 }
  0x90   : > { %p711_p2 = pneg %p710_p12 }
  0x91   : > { %p717_p7 = por %p716_p13, %p715_p6 }
  0x93   : > { %p718_p5 = pnand %p717_p7, %p711_p2 }
  0x95   : > { %721 = shalt.err (!%p718_p5)
}
  0x96   : > { %587 = dma.vmem_to_hbm [thread:$0]  (%p1207_p3), %s1147_s14, 8192, %s1145_s4, %s455_s16  }
  0x97 PF: > { %s481_s30 = sand.u32 1, %s752_s9   ;;  %p1208_p8 = scmp.ne.s32.totalorder %s1200_s22, 0 }
  0x98   : > { %p1209_p9 = scmp.ge.s32.totalorder %s764_s12, 2  ;;  %s482_s3 = scalar_lea.sflag [#allocation4], %s481_s30 }
  0x9a   : > { %p597_p0 = pnand %p1209_p9, %p1208_p8 }
  0x9c   : > { %747 = dma.done.wait (!%p597_p0), %s482_s3, 8192  }
  0x9d   : > { %749 = vsyncadd (!%p597_p0), %s482_s3, 4294959104  ;;  %p18_p1 = scmp.ge.s32.totalorder %s809_s15, 4   ;;  %s1210_s9 = smov %s756_s10 }
  0x9e   : > { %s1211_s10 = smov %s760_s11  ;;  %s1212_s11 = smov %s821_s18 }
  0x9f   : > { %s1213_s12 = smov %s809_s15  ;;  %20 = sbr.rel (!%p18_p1) target bundleno = 7 (0x7), region = 86 }
  0xa6   :  { %487 = vsyncpa [#allocation3], 1 }
  0xa7   :  { %489 = vsyncpa [#allocation3 + $0x1], 1 }
  0xa8   :  { %490 = vsyncpa [#allocation6], 1 }
  0xa9   :  { %492 = vsyncpa [#allocation6 + $0x1], 1 }
  0xaa   :  { %493 = vsyncpa [#allocation4], 1 }
  0xab   :  { %495 = vsyncpa [#allocation4 + $0x1], 1 }

</bundles_post_ra>
